<compile_context>
chip_gen: v7x
topology: tpu7x:2x2x1
jax: 0.10.0
libtpu: 0.0.40
codegen_flags: <defaults>
</compile_context>

<pallas_src>
import functools

import jax
import jax.numpy as jnp
from jax.experimental import pallas as pl
from jax.experimental.pallas import tpu as pltpu

# ITU-R 601-2 luma coefficients used by torchvision
_R_W, _G_W, _B_W = 0.2989, 0.587, 0.114
_LANE = 128
_TINY_PLANE_BYTES = 1 << 19     # below this, don't force extra grid steps
_MIN_STEPS_BIG = 8              # step-count floor for non-tiny problems


def _grayscale_kernel(x_ref, o_ref):
    # x_ref: (BN, 3, TR, L)   o_ref: (BN, noc, TR, L)
    # Per-channel reads with the f32 cast fused into the weighted sum (no
    # full-tile f32 intermediate -> lower vreg pressure).
    r = x_ref[:, 0, :, :].astype(jnp.float32)
    g = x_ref[:, 1, :, :].astype(jnp.float32)
    b = x_ref[:, 2, :, :].astype(jnp.float32)
    gray = (_R_W * r + _G_W * g + _B_W * b).astype(o_ref.dtype)  # (BN, TR, L)
    # Unrolled per-channel store: keeps the live vreg footprint at one gray
    # plane (instead of a noc-x broadcast intermediate) for noc == 3.
    for c in range(o_ref.shape[1]):
        o_ref[:, c, :, :] = gray


def _round_up(x: int, m: int) -> int:
    return ((x + m - 1) // m) * m


def _largest_divisor_leq(n: int, cap: int) -> int:
    cap = max(1, min(n, cap))
    for d in range(cap, 0, -1):
        if n % d == 0:
            return d
    return 1


def _gen_params():
    """(vmem_limit_bytes, target_plane_bytes) gated on the chip's VMEM size."""
    try:
        vmem_cap = int(pltpu.get_tpu_info().vmem_capacity_bytes)
    except Exception:
        vmem_cap = 64 << 20                 # conservative: assume v7x-sized VMEM
    if vmem_cap >= (96 << 20):              # v5e / v6e: 128 MiB physical VMEM
        return 64 << 20, 2 << 20            # bigger tiles amortize per-step overhead
    return 32 << 20, 1 << 20                # v7x: 64 MiB physical -> stay small


def _pick_tiles(N, rows, lane, sub, dsize, target_plane_bytes):
    """Pick (BN, TR, grid_n, grid_rows) for an (N, C, rows, lane) layout."""
    row_bytes = lane * dsize
    total_plane_bytes = N * rows * row_bytes

    # Step-count floor: enough steps for the double-buffered pipeline to
    # overlap DMA-in / compute / DMA-out and for v7x's 2 TCs to both get work.
    if total_plane_bytes <= _TINY_PLANE_BYTES:
        min_steps = min(N, 2)
    else:
        min_steps = _MIN_STEPS_BIG

    # Rows per step so one channel plane stays near target_plane_bytes.
    tr_cap = max(sub, (target_plane_bytes // row_bytes) // sub * sub)

    TR = tr_cap if rows > tr_cap else rows          # full dim is always legal
    grid_rows = pl.cdiv(rows, TR)

    # Pack several small images per step (amortize ~0.35us/step) but keep at
    # least `min_steps` total steps.  BN divides N so batch blocks stay exact.
    max_bn_by_bytes = max(1, tr_cap // max(1, TR))
    max_bn_by_steps = max(1, (N * grid_rows) // min_steps)
    BN = _largest_divisor_leq(N, min(max_bn_by_bytes, max_bn_by_steps))
    grid_n = N // BN

    # Still too few steps (e.g. rows <= tr_cap and small batch): split rows.
    if grid_n * grid_rows < min_steps and rows > sub:
        need = pl.cdiv(min_steps, grid_n)
        TR = max(sub, _round_up(pl.cdiv(rows, need), sub))
        if TR >= rows:
            TR = rows
        grid_rows = pl.cdiv(rows, TR)

    return BN, TR, grid_n, grid_rows


@functools.partial(jax.jit, static_argnames=("num_output_channels",))
def rgb_to_grayscale_pallas(x: jax.Array, num_output_channels: int = 1) -> jax.Array:
    """x: (N, 3, H, W) NCHW image batch -> (N, num_output_channels, H, W)."""
    N, C, H, W = x.shape
    assert C == 3, "rgb_to_grayscale expects 3 input channels"
    assert num_output_channels in (1, 3)
    noc = num_output_channels

    dsize = jnp.dtype(x.dtype).itemsize
    # Sublane packing multiple: 8 (f32), 16 (bf16/f16), 32 (int8/uint8).
    sub = 8 * max(1, 4 // dsize)
    vmem_limit, target_plane_bytes = _gen_params()

    P = H * W
    if P % _LANE == 0:
        # Lane-dense path: flatten spatial dims (free reshape for contiguous
        # NCHW) and re-block to (rows, 128) -> unmasked 128-wide stores.
        rows, lane = P // _LANE, _LANE
        x_in = x.reshape(N, 3, rows, lane)
    else:
        # Ragged path: tile the raw (N, 3, H, W) layout directly.  The block's
        # last dim equals the full W (always legal); stores on the final
        # partial 128-lane tile are masked, but there is no pad/slice copy.
        rows, lane = H, W
        x_in = x

    BN, TR, grid_n, grid_rows = _pick_tiles(
        N, rows, lane, sub, dsize, target_plane_bytes)

    # NOTE: rows % TR may be nonzero; the last row-block reads out-of-bounds
    # (padded) input and its out-of-bounds output rows are dropped — standard
    # blocked-BlockSpec boundary semantics.
    # TODO(synk): for noc == 3 the kernel writes three identical planes to
    # match the module's output contract; a consumer that accepts an implicit
    # channel broadcast could take the 1-channel output and save ~1.5x HBM
    # write traffic.
    out4 = pl.pallas_call(
        _grayscale_kernel,
        out_shape=jax.ShapeDtypeStruct((N, noc, rows, lane), x.dtype),
        grid_spec=pltpu.PrefetchScalarGridSpec(
            num_scalar_prefetch=0,
            grid=(grid_n, grid_rows),
            in_specs=[pl.BlockSpec((BN, 3, TR, lane), lambda n, r: (n, 0, r, 0))],
            out_specs=pl.BlockSpec((BN, noc, TR, lane), lambda n, r: (n, 0, r, 0)),
        ),
        compiler_params=pltpu.CompilerParams(
            dimension_semantics=("parallel", "parallel"),
            vmem_limit_bytes=vmem_limit,
        ),
    )(x_in)

    return out4.reshape(N, noc, H, W)


class GrayscalePallas:
    """Mirror of the PyTorch `Grayscale` module: applies rgb_to_grayscale to a
    tuple of images (NCHW jax arrays), passing None entries through."""

    def __init__(self, num_output_channels: int = 1) -> None:
        self.num_output_channels = num_output_channels

    def __call__(self, imgs):
        return tuple(
            rgb_to_grayscale_pallas(img, num_output_channels=self.num_output_channels)
            if img is not None
            else None
            for img in imgs
        )

    def __repr__(self) -> str:
        return f"GrayscalePallas(num_output_channels={self.num_output_channels})"


def _reference_grayscale(x, num_output_channels):
    r = x[:, 0].astype(jnp.float32)
    g = x[:, 1].astype(jnp.float32)
    b = x[:, 2].astype(jnp.float32)
    gray = (_R_W * r + _G_W * g + _B_W * b).astype(x.dtype)[:, None]
    if num_output_channels == 3:
        gray = jnp.broadcast_to(gray, (x.shape[0], 3) + x.shape[2:])
    return gray


if __name__ == "__main__":
    key = jax.random.PRNGKey(0)
    k1, k2, k3, k4 = jax.random.split(key, 4)
    img_a = jax.random.uniform(k1, (2, 3, 16, 16), dtype=jnp.float32)
    img_b = jax.random.uniform(k2, (2, 3, 16, 16), dtype=jnp.float32)
    # H*W not a multiple of 128 -> exercises the ragged (no pad/slice) path.
    img_c = jax.random.uniform(k3, (2, 3, 24, 24), dtype=jnp.float32)

    # Tuple input with a None, like the PyTorch module supports.
    imgs = (img_a, None, img_b, img_c)

    transform_1ch = GrayscalePallas(num_output_channels=1)
    transform_3ch = GrayscalePallas(num_output_channels=3)

    out_1ch = transform_1ch(imgs)
    out_3ch = transform_3ch(imgs)

    # bf16 input sanity check (cast fused in-kernel, matches f32-accum ref).
    img_bf16 = img_a.astype(jnp.bfloat16)
    out_bf16 = rgb_to_grayscale_pallas(img_bf16, num_output_channels=1)

    # uint8 input sanity check (f32 accumulate, truncating cast back to uint8,
    # matching torchvision's .to(img.dtype) behavior).
    img_u8 = (jax.random.uniform(k4, (2, 3, 16, 16)) * 255.0).astype(jnp.uint8)
    out_u8 = rgb_to_grayscale_pallas(img_u8, num_output_channels=1)

    for o in out_1ch + out_3ch + (out_bf16, out_u8):
        if o is not None:
            jax.block_until_ready(o)

    # Correctness checks against a pure-JAX reference
    assert out_1ch[1] is None and out_3ch[1] is None
    for inp, got in ((img_a, out_1ch[0]), (img_b, out_1ch[2]), (img_c, out_1ch[3])):
        ref = _reference_grayscale(inp, 1)
        assert got.shape == (inp.shape[0], 1) + inp.shape[2:]
        assert jnp.allclose(got, ref, atol=1e-6), "1-channel mismatch"
    for inp, got in ((img_a, out_3ch[0]), (img_b, out_3ch[2]), (img_c, out_3ch[3])):
        ref = _reference_grayscale(inp, 3)
        assert got.shape == (inp.shape[0], 3) + inp.shape[2:]
        assert jnp.allclose(got, ref, atol=1e-6), "3-channel mismatch"

    ref_bf16 = _reference_grayscale(img_bf16, 1)
    assert jnp.allclose(out_bf16.astype(jnp.float32),
                        ref_bf16.astype(jnp.float32), atol=1e-2), "bf16 mismatch"

    ref_u8 = _reference_grayscale(img_u8, 1)
    diff_u8 = jnp.abs(out_u8.astype(jnp.int32) - ref_u8.astype(jnp.int32))
    assert int(diff_u8.max()) <= 1, "uint8 mismatch"

    print("KERNEL_OK")
</pallas_src>

<mosaic_0001>
module attributes {stable_mosaic.version = 11 : i64} {
  func.func @_grayscale_kernel(%arg0: i32, %arg1: i32, %arg2: memref<1x3x2x128xf32, #tpu.memory_space<vmem>>, %arg3: memref<1x1x2x128xf32, #tpu.memory_space<vmem>>) attributes {dimension_semantics = [#tpu.dimension_semantics<parallel>, #tpu.dimension_semantics<parallel>], iteration_bounds = array<i64: 2, 1>, scalar_prefetch = 0 : i64, scratch_operands = 0 : i64, tpu.core_type = #tpu.core_type<tc>, window_params = [{transform_indices = @transform_0, window_bounds = array<i64: 1, 3, 2, 128>}, {transform_indices = @transform_1, window_bounds = array<i64: 1, 1, 2, 128>}]} {
    %c0 = arith.constant 0 : index
    %c0_0 = arith.constant 0 : index
    %c0_1 = arith.constant 0 : index
    %c0_2 = arith.constant 0 : index
    %0 = vector.load %arg2[%c0, %c0_0, %c0_1, %c0_2] : memref<1x3x2x128xf32, #tpu.memory_space<vmem>>, vector<1x1x2x128xf32>
    %1 = vector.shape_cast %0 : vector<1x1x2x128xf32> to vector<1x2x128xf32>
    %c0_3 = arith.constant 0 : index
    %c1 = arith.constant 1 : index
    %c0_4 = arith.constant 0 : index
    %c0_5 = arith.constant 0 : index
    %2 = vector.load %arg2[%c0_3, %c1, %c0_4, %c0_5] : memref<1x3x2x128xf32, #tpu.memory_space<vmem>>, vector<1x1x2x128xf32>
    %3 = vector.shape_cast %2 : vector<1x1x2x128xf32> to vector<1x2x128xf32>
    %c0_6 = arith.constant 0 : index
    %c2 = arith.constant 2 : index
    %c0_7 = arith.constant 0 : index
    %c0_8 = arith.constant 0 : index
    %4 = vector.load %arg2[%c0_6, %c2, %c0_7, %c0_8] : memref<1x3x2x128xf32, #tpu.memory_space<vmem>>, vector<1x1x2x128xf32>
    %5 = vector.shape_cast %4 : vector<1x1x2x128xf32> to vector<1x2x128xf32>
    %cst = arith.constant 2.989000e-01 : f32
    %6 = vector.broadcast %cst : f32 to vector<1x2x128xf32>
    %7 = arith.mulf %6, %1 : vector<1x2x128xf32>
    %cst_9 = arith.constant 5.870000e-01 : f32
    %8 = vector.broadcast %cst_9 : f32 to vector<1x2x128xf32>
    %9 = arith.mulf %8, %3 : vector<1x2x128xf32>
    %10 = arith.addf %7, %9 : vector<1x2x128xf32>
    %cst_10 = arith.constant 1.140000e-01 : f32
    %11 = vector.broadcast %cst_10 : f32 to vector<1x2x128xf32>
    %12 = arith.mulf %11, %5 : vector<1x2x128xf32>
    %13 = arith.addf %10, %12 : vector<1x2x128xf32>
    %c0_11 = arith.constant 0 : index
    %c0_12 = arith.constant 0 : index
    %c0_13 = arith.constant 0 : index
    %c0_14 = arith.constant 0 : index
    %14 = vector.load %arg3[%c0_11, %c0_12, %c0_13, %c0_14] : memref<1x1x2x128xf32, #tpu.memory_space<vmem>>, vector<1x1x2x128xf32>
    %15 = vector.shape_cast %14 : vector<1x1x2x128xf32> to vector<1x2x128xf32>
    %16 = vector.shape_cast %13 : vector<1x2x128xf32> to vector<1x1x2x128xf32>
    tpu.vector_store %arg3[%c0_11, %c0_12, %c0_13, %c0_14], %16 {strides = array<i32>} : memref<1x1x2x128xf32, #tpu.memory_space<vmem>>, vector<1x1x2x128xf32>,
    return
  }
  func.func @transform_0(%arg0: i32, %arg1: i32) -> (i32, i32, i32, i32) {
    %c0_i32 = arith.constant 0 : i32
    %c0_i32_0 = arith.constant 0 : i32
    %c0_i32_1 = arith.constant 0 : i32
    return %arg0, %c0_i32, %arg1, %c0_i32_0 : i32, i32, i32, i32
  }
  func.func @transform_1(%arg0: i32, %arg1: i32) -> (i32, i32, i32, i32) {
    %c0_i32 = arith.constant 0 : i32
    %c0_i32_0 = arith.constant 0 : i32
    %c0_i32_1 = arith.constant 0 : i32
    return %arg0, %c0_i32, %arg1, %c0_i32_0 : i32, i32, i32, i32
  }
}

</mosaic_0001>

<bundles_post_ra>
// kernel: rgb_to_grayscale_pallas.1
= control target key start
LH: loop header
LB: loop body
LE: loop exit
PB: predicated region body
PF: predicated region fallthrough
CT: control target
= control target key end

     0   :  { %s304_s6 = smov 0   ;;  %s306_s7 = smov 0   ;;  %s325_s0 = inlined_call_operand.vmem [shape: f32[2,3,2,128], index: 0, kind: input, shape index: {}]   ;;  %s326_s1 = inlined_call_operand.vmem [shape: f32[2,1,2,128], index: 1, kind: output, shape index: {}]  }
   0x1   :  { %s308_s8 = smov 0  }
   0x2 LB: > { %s23_s9 = sadd.s32 1, %s288_s7  ;;  %p238_p0 = scmp.ge.s32.totalorder %s292_s8, 1  ;;  %s292_s8 = sphi %s308_s8, %s11_s8   ;;  %s288_s7 = sphi %s306_s7, %s328_s7   ;;  %s284_s6 = sphi %s304_s6, %s327_s6  }
   0x3   : > { %p25_p1 = scmp.ge.s32.totalorder %s23_s9, 2  ;;  %p106_p2 = scmp.lt.s32.totalorder %s292_s8, 3 }
   0x5   : > { %s330_s9 = smov (%p25_p1, %s23_s9), 0  ;;  %p107_p3 = pnand %p238_p0, %p106_p2 }
   0x6   : > { %p131_p4 = scmp.lt.s32.totalorder (!%p107_p3), %s284_s6, 1 }
   0x7   : > { %110 = sbr.rel (%p107_p3) target bundleno = 26 (0x1a), region = 24 }
   0xe   : > { %s332_s6 = smov (!%p131_p4, %s284_s6), 1 }
   0xf   : > { %s245_s10 = smul.u32 6, %s332_s6  ;;  %s240_s14 = sshll.u32 %s332_s6, 1 }
  0x10   : > { %s145_s17 = scalar_lea.vmem %s326_s1, %s240_s14 }
  0x11   : > { %s138_s13 = scalar_lea.vmem %s325_s0, %s245_s10 }
  0x12   : > { %v146_v0 = vld [vmem:[%s138_s13] sm:$0x3]  ;;  %v241_v1 = vld [vmem:[%s138_s13 + $0x2] sm:$0x3]  ;;  %v242_v2 = vld [vmem:[%s138_s13 + $0x4] sm:$0x3] }
  0x13   : > { %v151_v3 = vmul.f32 0.2989, %v146_v0  ;;  %v152_v4 = vmul.f32 0.587, %v241_v1  ;;  %v154_v5 = vmul.f32 0.114, %v242_v2 }
  0x15   : > { %v153_v6 = vadd.f32 %v152_v4, %v151_v3 }
  0x17   : > { %v155_v7 = vadd.f32 %v154_v5, %v153_v6 }
  0x19   : > { %156 = vst [vmem:[%s145_s17] sm:$0x3] %v155_v7 }
  0x1a PF: > { %s11_s8 = sadd.s32 1, %s292_s8   ;;  %s327_s6 = smov %s288_s7 }
  0x1b   : > { %p8_p5 = scmp.ge.s32.totalorder %s11_s8, 4   ;;  %s328_s7 = smov %s330_s9 }
  0x1d   :  { %10 = sbr.rel (!%p8_p5) target bundleno = 2 (0x2), region = 56 }

</bundles_post_ra>
